<compile_context>
chip_gen: v7x
topology: tpu7x:2x2x1
jax: 0.10.0
libtpu: 0.0.40
codegen_flags: <defaults>
</compile_context>

<pallas_src>
import functools

import jax
import jax.numpy as jnp
from jax.experimental import pallas as pl
from jax.experimental.pallas import tpu as pltpu

LANES = 128
SUBLANES = 8


def _round_up(v, m):
    return -(-v // m) * m


def _default_max_block_rows():
    # Bigger blocks amortise the ~0.35us fixed per-grid-step cost.  On v7x
    # (64 MiB VMEM/TC but ~3.2 TB/s HBM) the step cost dominates even more, so
    # go larger there: 8192 rows x 3 inputs x 2 buffers x 4 B = 24 MiB, well
    # under the 32 MiB default scoped limit and the 64 MiB physical VMEM.
    try:
        info = pltpu.get_tpu_info()
        vmem = int(getattr(info, "vmem_capacity_bytes", 0) or 0)
        if 0 < vmem <= 96 * 1024 * 1024:   # v7x-class part (64 MiB VMEM per TC)
            return 8192
    except Exception:
        pass
    return 4096                            # v5e / v6e (128 MiB VMEM)


def _partials_kernel(x_ref, t_ref, w_ref, o_ref, *, ragged, valid_rows_last):
    """Accumulate (5, 8, 128) per-sublane/lane partial sums over the row blocks."""
    i = pl.program_id(0)
    last = pl.num_programs(0) - 1

    @pl.when(i == 0)
    def _():
        o_ref[...] = jnp.zeros_like(o_ref)

    # Stream native dtypes, upcast in-register; accumulate in f32.
    x = x_ref[...].astype(jnp.float32)
    t = t_ref[...].astype(jnp.float32)
    w = w_ref[...].astype(jnp.float32)

    def accumulate(x, t, w):
        g = x.shape[0] // SUBLANES
        tw = t * w
        wx = w * x
        wxt = wx * t
        wxtt = wxt * t

        def red(v):
            # Sublane-aligned leading-axis reduction: pure VALU vreg adds,
            # no cross-sublane XLU collapse per step.
            return v.reshape(g, SUBLANES, LANES).sum(axis=0)

        o_ref[0] += red(tw)      # dot(t, w)
        o_ref[1] += red(w)       # sum(w)
        o_ref[2] += red(wx)      # sum(w*x)
        o_ref[3] += red(wxt)     # sum(w*x*t)
        o_ref[4] += red(wxtt)    # sum(w*x*t^2)

    if not ragged:
        accumulate(x, t, w)
    else:
        @pl.when(i != last)
        def _():
            accumulate(x, t, w)

        @pl.when(i == last)
        def _():
            # Rows beyond the array in the edge block hold undefined VMEM:
            # select (not multiply) them away before any arithmetic.
            row = jax.lax.broadcasted_iota(jnp.int32, x.shape, 0)
            m = row < valid_rows_last
            zero = jnp.zeros_like(x)
            accumulate(jnp.where(m, x, zero),
                       jnp.where(m, t, zero),
                       jnp.where(m, w, zero))


def significance_loss(inputs, targets, weight, *, sig_wgt, bkg_wgt, br=10.0,
                      max_block_rows=None):
    """Pallas TPU implementation of SignificanceLoss.forward (func=calc_ams_torch)."""
    x = jnp.reshape(inputs, (-1,))
    t = jnp.reshape(targets, (-1,))
    w = jnp.reshape(weight, (-1,))
    n = x.shape[0]

    n_main = (n // LANES) * LANES          # lane-aligned prefix handled by kernel
    rows = n_main // LANES

    if max_block_rows is None:
        max_block_rows = _default_max_block_rows()

    p = jnp.zeros((5,), jnp.float32)

    if rows > 0:
        # block_rows a multiple of 32 so (8,128)/(16,128)/(32,128) min tiles of
        # f32/bf16/int8 inputs are all respected; row raggedness is masked.
        block_rows = min(int(max_block_rows), _round_up(rows, 32))
        num_blocks = -(-rows // block_rows)
        ragged = num_blocks * block_rows != rows
        valid_rows_last = rows - (num_blocks - 1) * block_rows

        def view(a):
            # TODO(synk): for lane-unaligned N this prefix slice may still
            # materialise a copy of the main part; a fully copy-free path needs
            # memory_space=pl.ANY + manual DMA of the raw 1-D buffers.
            a2 = a if n_main == n else a[:n_main]
            return a2.reshape(rows, LANES)

        x2, t2, w2 = view(x), view(t), view(w)

        def blk():
            return pl.BlockSpec((block_rows, LANES), lambda i: (i, 0))

        kernel = functools.partial(_partials_kernel, ragged=bool(ragged),
                                   valid_rows_last=int(valid_rows_last))

        in_bytes = sum(int(a.size) * a.dtype.itemsize for a in (x2, t2, w2))
        block_bytes = sum(block_rows * LANES * a.dtype.itemsize
                          for a in (x2, t2, w2))
        out_bytes = 5 * SUBLANES * LANES * 4
        # 3 inputs x double buffering + accumulator + headroom; set explicitly so
        # large blocks also compile under v5e's 16 MiB default scoped VMEM.
        vmem_limit = int(2 * block_bytes + 2 * out_bytes + (4 << 20))

        # TODO(synk): on v7x (2 TensorCores/chip) add a leading grid axis of size
        # 2 marked pltpu.CORE_PARALLEL and emit per-core (5, 8, 128) partials
        # (the epilogue already lives in the wrapper, so combining is a sum);
        # plain "parallel" semantics do not shard work across the two cores.
        partials = pl.pallas_call(
            kernel,
            out_shape=jax.ShapeDtypeStruct((5, SUBLANES, LANES), jnp.float32),
            grid_spec=pltpu.PrefetchScalarGridSpec(
                num_scalar_prefetch=0,
                grid=(num_blocks,),
                in_specs=[blk(), blk(), blk()],
                out_specs=pl.BlockSpec((5, SUBLANES, LANES),
                                       lambda i: (0, 0, 0)),
            ),
            compiler_params=pltpu.CompilerParams(
                dimension_semantics=("arbitrary",),
                vmem_limit_bytes=vmem_limit),
            cost_estimate=pl.CostEstimate(
                flops=9 * rows * LANES,
                transcendentals=0,
                bytes_accessed=in_bytes + out_bytes),
        )(x2, t2, w2)
        p = p + partials.sum(axis=(1, 2))

    if n_main < n:
        # <128-element lane tail: trivial jnp reduction, avoids padding/copying
        # the full arrays just to make them a multiple of 128.
        xt = x[n_main:].astype(jnp.float32)
        tt = t[n_main:].astype(jnp.float32)
        wt = w[n_main:].astype(jnp.float32)
        tw = tt * wt
        wx = wt * xt
        p = p + jnp.stack([jnp.sum(tw), jnp.sum(wt), jnp.sum(wx),
                           jnp.sum(wx * tt), jnp.sum(wx * tt * tt)])

    sum_tw, sum_w, sum_wx, sum_wxt, sum_wxtt = p[0], p[1], p[2], p[3], p[4]
    dot_tw = sum_tw                         # dot(t, w)
    dot_bw = sum_w - sum_tw                 # dot(1 - t, w), exact
    num_s = sum_wxtt                        # sum(w*x*t^2)
    num_b = sum_wx - 2.0 * sum_wxt + sum_wxtt   # sum(w*x*(1-t)^2), exact algebra

    s = sig_wgt * num_s / dot_tw
    b = bkg_wgt * num_b / dot_bw
    # calc_ams_torch(s, b, br)
    ams = jnp.sqrt(2.0 * ((s + b + br) * jnp.log1p(s / (b + br)) - s))
    return 1.0 / ams


def _reference(inputs, targets, weight, *, sig_wgt, bkg_wgt, br=10.0):
    x = jnp.reshape(inputs, (-1,)).astype(jnp.float32)
    t = jnp.reshape(targets, (-1,)).astype(jnp.float32)
    w = jnp.reshape(weight, (-1,)).astype(jnp.float32)
    sig_w = t * w * sig_wgt / jnp.dot(t, w)
    bkg_w = (1.0 - t) * w * bkg_wgt / jnp.dot(1.0 - t, w)
    s = jnp.dot(sig_w * x, t)
    b = jnp.dot(bkg_w * x, 1.0 - t)
    ams = jnp.sqrt(2.0 * ((s + b + br) * jnp.log(1.0 + s / (b + br)) - s))
    return 1.0 / ams


def _make_inputs(key, n, pred_dtype=jnp.float32, wgt_dtype=jnp.float32):
    k1, k2, k3 = jax.random.split(key, 3)
    preds = jax.nn.sigmoid(
        jax.random.normal(k1, (n, 1), dtype=jnp.float32)).astype(pred_dtype)
    targets = jax.random.bernoulli(k2, p=0.3, shape=(n, 1)).astype(jnp.float32)
    weight = jax.random.uniform(k3, (n, 1), dtype=jnp.float32,
                                minval=0.1, maxval=2.0).astype(wgt_dtype)
    return preds, targets, weight


if __name__ == "__main__":
    key = jax.random.PRNGKey(0)
    sig_wgt, bkg_wgt, br = 50.0, 1000.0, 10.0

    cases = [
        # (n, max_block_rows, pred dtype, weight dtype)
        dict(n=2000, max_block_rows=None),    # lane tail (<128) + ragged single block
        dict(n=12288, max_block_rows=32),     # multi-block grid, exact fit, f32
        dict(n=5000, max_block_rows=32),      # multi-block, ragged last block + tail
        dict(n=12288, max_block_rows=64,      # narrow-dtype streaming (bf16 x/w)
             pred_dtype=jnp.bfloat16, wgt_dtype=jnp.bfloat16),
    ]
    for idx, case in enumerate(cases):
        key, sub = jax.random.split(key)
        preds, targets, weight = _make_inputs(
            sub, case["n"],
            case.get("pred_dtype", jnp.float32),
            case.get("wgt_dtype", jnp.float32))
        loss = significance_loss(preds, targets, weight,
                                 sig_wgt=sig_wgt, bkg_wgt=bkg_wgt, br=br,
                                 max_block_rows=case["max_block_rows"])
        loss = jax.block_until_ready(loss)
        ref = _reference(preds, targets, weight,
                         sig_wgt=sig_wgt, bkg_wgt=bkg_wgt, br=br)
        assert jnp.allclose(loss, ref, rtol=5e-4, atol=1e-6), \
            (idx, float(loss), float(ref))

    print("KERNEL_OK")
</pallas_src>

<mosaic_0001>
module attributes {stable_mosaic.version = 11 : i64} {
  func.func @_partials_kernel(%arg0: i32, %arg1: memref<32x128xf32, #tpu.memory_space<vmem>>, %arg2: memref<32x128xf32, #tpu.memory_space<vmem>>, %arg3: memref<32x128xf32, #tpu.memory_space<vmem>>, %arg4: memref<5x8x128xf32, #tpu.memory_space<vmem>>) attributes {dimension_semantics = [#tpu.dimension_semantics<arbitrary>], iteration_bounds = array<i64: 1>, scalar_prefetch = 0 : i64, scratch_operands = 0 : i64, tpu.core_type = #tpu.core_type<tc>, window_params = [{transform_indices = @transform_0, window_bounds = array<i64: 32, 128>}, {transform_indices = @transform_1, window_bounds = array<i64: 32, 128>}, {transform_indices = @transform_2, window_bounds = array<i64: 32, 128>}, {pipeline_mode = #tpu.pipeline_mode<synchronous>, transform_indices = @transform_3, window_bounds = array<i64: 5, 8, 128>}]} {
    %c0_i32 = arith.constant 0 : i32
    %0 = arith.cmpi eq, %arg0, %c0_i32 : i32
    %1 = arith.extui %0 : i1 to i32
    %c0_i32_0 = arith.constant 0 : i32
    %2 = arith.cmpi ne, %1, %c0_i32_0 : i32
    scf.if %2 {
      %cst = arith.constant 0.000000e+00 : f32
      %12 = vector.broadcast %cst : f32 to vector<5x8x128xf32>
      %c0_10 = arith.constant 0 : index
      %c0_11 = arith.constant 0 : index
      %c0_12 = arith.constant 0 : index
      %13 = vector.load %arg4[%c0_10, %c0_11, %c0_12] : memref<5x8x128xf32, #tpu.memory_space<vmem>>, vector<5x8x128xf32>
      tpu.vector_store %arg4[%c0_10, %c0_11, %c0_12], %12 {strides = array<i32>} : memref<5x8x128xf32, #tpu.memory_space<vmem>>, vector<5x8x128xf32>,
    } else {
    }
    %c0 = arith.constant 0 : index
    %c0_1 = arith.constant 0 : index
    %3 = vector.load %arg1[%c0, %c0_1] : memref<32x128xf32, #tpu.memory_space<vmem>>, vector<32x128xf32>
    %c0_2 = arith.constant 0 : index
    %c0_3 = arith.constant 0 : index
    %4 = vector.load %arg2[%c0_2, %c0_3] : memref<32x128xf32, #tpu.memory_space<vmem>>, vector<32x128xf32>
    %c0_4 = arith.constant 0 : index
    %c0_5 = arith.constant 0 : index
    %5 = vector.load %arg3[%c0_4, %c0_5] : memref<32x128xf32, #tpu.memory_space<vmem>>, vector<32x128xf32>
    %c0_i32_6 = arith.constant 0 : i32
    %6 = arith.cmpi ne, %arg0, %c0_i32_6 : i32
    %7 = arith.extui %6 : i1 to i32
    %c0_i32_7 = arith.constant 0 : i32
    %8 = arith.cmpi ne, %7, %c0_i32_7 : i32
    scf.if %8 {
      %12 = arith.mulf %4, %5 : vector<32x128xf32>
      %13 = arith.mulf %5, %3 : vector<32x128xf32>
      %14 = arith.mulf %13, %4 : vector<32x128xf32>
      %15 = arith.mulf %14, %4 : vector<32x128xf32>
      %c0_10 = arith.constant 0 : index
      %c0_11 = arith.constant 0 : index
      %c0_12 = arith.constant 0 : index
      %16 = vector.load %arg4[%c0_10, %c0_11, %c0_12] : memref<5x8x128xf32, #tpu.memory_space<vmem>>, vector<1x8x128xf32>
      %17 = vector.shape_cast %16 : vector<1x8x128xf32> to vector<8x128xf32>
      %18 = vector.shape_cast %12 : vector<32x128xf32> to vector<4x8x128xf32>
      %cst = arith.constant dense<0.000000e+00> : vector<8x128xf32>
      %19 = vector.multi_reduction <add>, %18, %cst [0] : vector<4x8x128xf32> to vector<8x128xf32>
      %20 = arith.addf %17, %19 : vector<8x128xf32>
      %c0_13 = arith.constant 0 : index
      %c0_14 = arith.constant 0 : index
      %c0_15 = arith.constant 0 : index
      %21 = vector.load %arg4[%c0_13, %c0_14, %c0_15] : memref<5x8x128xf32, #tpu.memory_space<vmem>>, vector<1x8x128xf32>
      %22 = vector.shape_cast %21 : vector<1x8x128xf32> to vector<8x128xf32>
      %23 = vector.shape_cast %20 : vector<8x128xf32> to vector<1x8x128xf32>
      tpu.vector_store %arg4[%c0_13, %c0_14, %c0_15], %23 {strides = array<i32>} : memref<5x8x128xf32, #tpu.memory_space<vmem>>, vector<1x8x128xf32>,
      %c1 = arith.constant 1 : index
      %c0_16 = arith.constant 0 : index
      %c0_17 = arith.constant 0 : index
      %24 = vector.load %arg4[%c1, %c0_16, %c0_17] : memref<5x8x128xf32, #tpu.memory_space<vmem>>, vector<1x8x128xf32>
      %25 = vector.shape_cast %24 : vector<1x8x128xf32> to vector<8x128xf32>
      %26 = vector.shape_cast %5 : vector<32x128xf32> to vector<4x8x128xf32>
      %cst_18 = arith.constant dense<0.000000e+00> : vector<8x128xf32>
      %27 = vector.multi_reduction <add>, %26, %cst_18 [0] : vector<4x8x128xf32> to vector<8x128xf32>
      %28 = arith.addf %25, %27 : vector<8x128xf32>
      %c1_19 = arith.constant 1 : index
      %c0_20 = arith.constant 0 : index
      %c0_21 = arith.constant 0 : index
      %29 = vector.load %arg4[%c1_19, %c0_20, %c0_21] : memref<5x8x128xf32, #tpu.memory_space<vmem>>, vector<1x8x128xf32>
      %30 = vector.shape_cast %29 : vector<1x8x128xf32> to vector<8x128xf32>
      %31 = vector.shape_cast %28 : vector<8x128xf32> to vector<1x8x128xf32>
      tpu.vector_store %arg4[%c1_19, %c0_20, %c0_21], %31 {strides = array<i32>} : memref<5x8x128xf32, #tpu.memory_space<vmem>>, vector<1x8x128xf32>,
      %c2 = arith.constant 2 : index
      %c0_22 = arith.constant 0 : index
      %c0_23 = arith.constant 0 : index
      %32 = vector.load %arg4[%c2, %c0_22, %c0_23] : memref<5x8x128xf32, #tpu.memory_space<vmem>>, vector<1x8x128xf32>
      %33 = vector.shape_cast %32 : vector<1x8x128xf32> to vector<8x128xf32>
      %34 = vector.shape_cast %13 : vector<32x128xf32> to vector<4x8x128xf32>
      %cst_24 = arith.constant dense<0.000000e+00> : vector<8x128xf32>
      %35 = vector.multi_reduction <add>, %34, %cst_24 [0] : vector<4x8x128xf32> to vector<8x128xf32>
      %36 = arith.addf %33, %35 : vector<8x128xf32>
      %c2_25 = arith.constant 2 : index
      %c0_26 = arith.constant 0 : index
      %c0_27 = arith.constant 0 : index
      %37 = vector.load %arg4[%c2_25, %c0_26, %c0_27] : memref<5x8x128xf32, #tpu.memory_space<vmem>>, vector<1x8x128xf32>
      %38 = vector.shape_cast %37 : vector<1x8x128xf32> to vector<8x128xf32>
      %39 = vector.shape_cast %36 : vector<8x128xf32> to vector<1x8x128xf32>
      tpu.vector_store %arg4[%c2_25, %c0_26, %c0_27], %39 {strides = array<i32>} : memref<5x8x128xf32, #tpu.memory_space<vmem>>, vector<1x8x128xf32>,
      %c3 = arith.constant 3 : index
      %c0_28 = arith.constant 0 : index
      %c0_29 = arith.constant 0 : index
      %40 = vector.load %arg4[%c3, %c0_28, %c0_29] : memref<5x8x128xf32, #tpu.memory_space<vmem>>, vector<1x8x128xf32>
      %41 = vector.shape_cast %40 : vector<1x8x128xf32> to vector<8x128xf32>
      %42 = vector.shape_cast %14 : vector<32x128xf32> to vector<4x8x128xf32>
      %cst_30 = arith.constant dense<0.000000e+00> : vector<8x128xf32>
      %43 = vector.multi_reduction <add>, %42, %cst_30 [0] : vector<4x8x128xf32> to vector<8x128xf32>
      %44 = arith.addf %41, %43 : vector<8x128xf32>
      %c3_31 = arith.constant 3 : index
      %c0_32 = arith.constant 0 : index
      %c0_33 = arith.constant 0 : index
      %45 = vector.load %arg4[%c3_31, %c0_32, %c0_33] : memref<5x8x128xf32, #tpu.memory_space<vmem>>, vector<1x8x128xf32>
      %46 = vector.shape_cast %45 : vector<1x8x128xf32> to vector<8x128xf32>
      %47 = vector.shape_cast %44 : vector<8x128xf32> to vector<1x8x128xf32>
      tpu.vector_store %arg4[%c3_31, %c0_32, %c0_33], %47 {strides = array<i32>} : memref<5x8x128xf32, #tpu.memory_space<vmem>>, vector<1x8x128xf32>,
      %c4 = arith.constant 4 : index
      %c0_34 = arith.constant 0 : index
      %c0_35 = arith.constant 0 : index
      %48 = vector.load %arg4[%c4, %c0_34, %c0_35] : memref<5x8x128xf32, #tpu.memory_space<vmem>>, vector<1x8x128xf32>
      %49 = vector.shape_cast %48 : vector<1x8x128xf32> to vector<8x128xf32>
      %50 = vector.shape_cast %15 : vector<32x128xf32> to vector<4x8x128xf32>
      %cst_36 = arith.constant dense<0.000000e+00> : vector<8x128xf32>
      %51 = vector.multi_reduction <add>, %50, %cst_36 [0] : vector<4x8x128xf32> to vector<8x128xf32>
      %52 = arith.addf %49, %51 : vector<8x128xf32>
      %c4_37 = arith.constant 4 : index
      %c0_38 = arith.constant 0 : index
      %c0_39 = arith.constant 0 : index
      %53 = vector.load %arg4[%c4_37, %c0_38, %c0_39] : memref<5x8x128xf32, #tpu.memory_space<vmem>>, vector<1x8x128xf32>
      %54 = vector.shape_cast %53 : vector<1x8x128xf32> to vector<8x128xf32>
      %55 = vector.shape_cast %52 : vector<8x128xf32> to vector<1x8x128xf32>
      tpu.vector_store %arg4[%c4_37, %c0_38, %c0_39], %55 {strides = array<i32>} : memref<5x8x128xf32, #tpu.memory_space<vmem>>, vector<1x8x128xf32>,
    } else {
    }
    %c0_i32_8 = arith.constant 0 : i32
    %9 = arith.cmpi eq, %arg0, %c0_i32_8 : i32
    %10 = arith.extui %9 : i1 to i32
    %c0_i32_9 = arith.constant 0 : i32
    %11 = arith.cmpi ne, %10, %c0_i32_9 : i32
    scf.if %11 {
      %12 = tpu.iota {dimensions = array<i32: 0>} : vector<32x128xi32>
      %c15_i32 = arith.constant 15 : i32
      %13 = vector.broadcast %c15_i32 : i32 to vector<32x128xi32>
      %14 = arith.cmpi slt, %12, %13 : vector<32x128xi32>
      %cst = arith.constant 0.000000e+00 : f32
      %15 = vector.broadcast %cst : f32 to vector<32x128xf32>
      %16 = arith.select %14, %3, %15 : vector<32x128xi1>, vector<32x128xf32>
      %17 = arith.select %14, %4, %15 : vector<32x128xi1>, vector<32x128xf32>
      %18 = arith.select %14, %5, %15 : vector<32x128xi1>, vector<32x128xf32>
      %19 = arith.mulf %17, %18 : vector<32x128xf32>
      %20 = arith.mulf %18, %16 : vector<32x128xf32>
      %21 = arith.mulf %20, %17 : vector<32x128xf32>
      %22 = arith.mulf %21, %17 : vector<32x128xf32>
      %c0_10 = arith.constant 0 : index
      %c0_11 = arith.constant 0 : index
      %c0_12 = arith.constant 0 : index
      %23 = vector.load %arg4[%c0_10, %c0_11, %c0_12] : memref<5x8x128xf32, #tpu.memory_space<vmem>>, vector<1x8x128xf32>
      %24 = vector.shape_cast %23 : vector<1x8x128xf32> to vector<8x128xf32>
      %25 = vector.shape_cast %19 : vector<32x128xf32> to vector<4x8x128xf32>
      %cst_13 = arith.constant dense<0.000000e+00> : vector<8x128xf32>
      %26 = vector.multi_reduction <add>, %25, %cst_13 [0] : vector<4x8x128xf32> to vector<8x128xf32>
      %27 = arith.addf %24, %26 : vector<8x128xf32>
      %c0_14 = arith.constant 0 : index
      %c0_15 = arith.constant 0 : index
      %c0_16 = arith.constant 0 : index
      %28 = vector.load %arg4[%c0_14, %c0_15, %c0_16] : memref<5x8x128xf32, #tpu.memory_space<vmem>>, vector<1x8x128xf32>
      %29 = vector.shape_cast %28 : vector<1x8x128xf32> to vector<8x128xf32>
      %30 = vector.shape_cast %27 : vector<8x128xf32> to vector<1x8x128xf32>
      tpu.vector_store %arg4[%c0_14, %c0_15, %c0_16], %30 {strides = array<i32>} : memref<5x8x128xf32, #tpu.memory_space<vmem>>, vector<1x8x128xf32>,
      %c1 = arith.constant 1 : index
      %c0_17 = arith.constant 0 : index
      %c0_18 = arith.constant 0 : index
      %31 = vector.load %arg4[%c1, %c0_17, %c0_18] : memref<5x8x128xf32, #tpu.memory_space<vmem>>, vector<1x8x128xf32>
      %32 = vector.shape_cast %31 : vector<1x8x128xf32> to vector<8x128xf32>
      %33 = vector.shape_cast %18 : vector<32x128xf32> to vector<4x8x128xf32>
      %cst_19 = arith.constant dense<0.000000e+00> : vector<8x128xf32>
      %34 = vector.multi_reduction <add>, %33, %cst_19 [0] : vector<4x8x128xf32> to vector<8x128xf32>
      %35 = arith.addf %32, %34 : vector<8x128xf32>
      %c1_20 = arith.constant 1 : index
      %c0_21 = arith.constant 0 : index
      %c0_22 = arith.constant 0 : index
      %36 = vector.load %arg4[%c1_20, %c0_21, %c0_22] : memref<5x8x128xf32, #tpu.memory_space<vmem>>, vector<1x8x128xf32>
      %37 = vector.shape_cast %36 : vector<1x8x128xf32> to vector<8x128xf32>
      %38 = vector.shape_cast %35 : vector<8x128xf32> to vector<1x8x128xf32>
      tpu.vector_store %arg4[%c1_20, %c0_21, %c0_22], %38 {strides = array<i32>} : memref<5x8x128xf32, #tpu.memory_space<vmem>>, vector<1x8x128xf32>,
      %c2 = arith.constant 2 : index
      %c0_23 = arith.constant 0 : index
      %c0_24 = arith.constant 0 : index
      %39 = vector.load %arg4[%c2, %c0_23, %c0_24] : memref<5x8x128xf32, #tpu.memory_space<vmem>>, vector<1x8x128xf32>
      %40 = vector.shape_cast %39 : vector<1x8x128xf32> to vector<8x128xf32>
      %41 = vector.shape_cast %20 : vector<32x128xf32> to vector<4x8x128xf32>
      %cst_25 = arith.constant dense<0.000000e+00> : vector<8x128xf32>
      %42 = vector.multi_reduction <add>, %41, %cst_25 [0] : vector<4x8x128xf32> to vector<8x128xf32>
      %43 = arith.addf %40, %42 : vector<8x128xf32>
      %c2_26 = arith.constant 2 : index
      %c0_27 = arith.constant 0 : index
      %c0_28 = arith.constant 0 : index
      %44 = vector.load %arg4[%c2_26, %c0_27, %c0_28] : memref<5x8x128xf32, #tpu.memory_space<vmem>>, vector<1x8x128xf32>
      %45 = vector.shape_cast %44 : vector<1x8x128xf32> to vector<8x128xf32>
      %46 = vector.shape_cast %43 : vector<8x128xf32> to vector<1x8x128xf32>
      tpu.vector_store %arg4[%c2_26, %c0_27, %c0_28], %46 {strides = array<i32>} : memref<5x8x128xf32, #tpu.memory_space<vmem>>, vector<1x8x128xf32>,
      %c3 = arith.constant 3 : index
      %c0_29 = arith.constant 0 : index
      %c0_30 = arith.constant 0 : index
      %47 = vector.load %arg4[%c3, %c0_29, %c0_30] : memref<5x8x128xf32, #tpu.memory_space<vmem>>, vector<1x8x128xf32>
      %48 = vector.shape_cast %47 : vector<1x8x128xf32> to vector<8x128xf32>
      %49 = vector.shape_cast %21 : vector<32x128xf32> to vector<4x8x128xf32>
      %cst_31 = arith.constant dense<0.000000e+00> : vector<8x128xf32>
      %50 = vector.multi_reduction <add>, %49, %cst_31 [0] : vector<4x8x128xf32> to vector<8x128xf32>
      %51 = arith.addf %48, %50 : vector<8x128xf32>
      %c3_32 = arith.constant 3 : index
      %c0_33 = arith.constant 0 : index
      %c0_34 = arith.constant 0 : index
      %52 = vector.load %arg4[%c3_32, %c0_33, %c0_34] : memref<5x8x128xf32, #tpu.memory_space<vmem>>, vector<1x8x128xf32>
      %53 = vector.shape_cast %52 : vector<1x8x128xf32> to vector<8x128xf32>
      %54 = vector.shape_cast %51 : vector<8x128xf32> to vector<1x8x128xf32>
      tpu.vector_store %arg4[%c3_32, %c0_33, %c0_34], %54 {strides = array<i32>} : memref<5x8x128xf32, #tpu.memory_space<vmem>>, vector<1x8x128xf32>,
      %c4 = arith.constant 4 : index
      %c0_35 = arith.constant 0 : index
      %c0_36 = arith.constant 0 : index
      %55 = vector.load %arg4[%c4, %c0_35, %c0_36] : memref<5x8x128xf32, #tpu.memory_space<vmem>>, vector<1x8x128xf32>
      %56 = vector.shape_cast %55 : vector<1x8x128xf32> to vector<8x128xf32>
      %57 = vector.shape_cast %22 : vector<32x128xf32> to vector<4x8x128xf32>
      %cst_37 = arith.constant dense<0.000000e+00> : vector<8x128xf32>
      %58 = vector.multi_reduction <add>, %57, %cst_37 [0] : vector<4x8x128xf32> to vector<8x128xf32>
      %59 = arith.addf %56, %58 : vector<8x128xf32>
      %c4_38 = arith.constant 4 : index
      %c0_39 = arith.constant 0 : index
      %c0_40 = arith.constant 0 : index
      %60 = vector.load %arg4[%c4_38, %c0_39, %c0_40] : memref<5x8x128xf32, #tpu.memory_space<vmem>>, vector<1x8x128xf32>
      %61 = vector.shape_cast %60 : vector<1x8x128xf32> to vector<8x128xf32>
      %62 = vector.shape_cast %59 : vector<8x128xf32> to vector<1x8x128xf32>
      tpu.vector_store %arg4[%c4_38, %c0_39, %c0_40], %62 {strides = array<i32>} : memref<5x8x128xf32, #tpu.memory_space<vmem>>, vector<1x8x128xf32>,
    } else {
    }
    return
  }
  func.func @transform_0(%arg0: i32) -> (i32, i32) {
    %c0_i32 = arith.constant 0 : i32
    %c0_i32_0 = arith.constant 0 : i32
    return %arg0, %c0_i32 : i32, i32
  }
  func.func @transform_1(%arg0: i32) -> (i32, i32) {
    %c0_i32 = arith.constant 0 : i32
    %c0_i32_0 = arith.constant 0 : i32
    return %arg0, %c0_i32 : i32, i32
  }
  func.func @transform_2(%arg0: i32) -> (i32, i32) {
    %c0_i32 = arith.constant 0 : i32
    %c0_i32_0 = arith.constant 0 : i32
    return %arg0, %c0_i32 : i32, i32
  }
  func.func @transform_3(%arg0: i32) -> (i32, i32, i32) {
    %c0_i32 = arith.constant 0 : i32
    %c0_i32_0 = arith.constant 0 : i32
    %c0_i32_1 = arith.constant 0 : i32
    %c0_i32_2 = arith.constant 0 : i32
    return %c0_i32, %c0_i32_0, %c0_i32_1 : i32, i32, i32
  }
}

</mosaic_0001>

<bundles_post_ra>
// kernel: tpu_custom_call.1
= control target key start
LH: loop header
LB: loop body
LE: loop exit
PB: predicated region body
PF: predicated region fallthrough
CT: control target
= control target key end

     0   :  { %8 = vsyncpa [#allocation3], 0  ;;  %s410_s0 = inlined_call_operand.hbm [shape: f32[15,128], index: 0, kind: input, shape index: {}]   ;;  %s411_s1 = inlined_call_operand.hbm [shape: f32[15,128], index: 1, kind: input, shape index: {}]   ;;  %s412_s2 = inlined_call_operand.hbm [shape: f32[15,128], index: 2, kind: input, shape index: {}]   ;;  %s413_s3 = inlined_call_operand.hbm [shape: f32[5,8,128], index: 3, kind: output, shape index: {}]  }
   0x1   :  { %9 = vsyncpa [#allocation6], 0 }
   0x2   :  { %10 = vsyncpa [#allocation4], 0 }
   0x3   :  { %15 = vsyncadd [#allocation3], 256  ;;  %s324_s12 = smov [#allocation2]   ;;  %s230_s16 = scalar_lea.hbm %s410_s0, 256 }
   0x4   :  { %s16_s13 = sshll.u32 %s324_s12, 4  ;;  %p231_p0 = scmp.ne.s32.totalorder %s410_s0, %s230_s16  ;;  %s17_s13 = int_to_ptr.vmem [resolvable:$true] %s16_s13 }
   0x5   :  { %p234_p1 = scmp.lt.u32.totalorder %s230_s16, %s410_s0 }
   0x7   :  { %p236_p2 = pnand %p234_p1, %p231_p0 }
   0x9   :  { %239 = shalt.err (!%p236_p2)
}
   0xa   :  { %s240_s21 = scalar_lea.vmem %s17_s13, 256  ;;  %s244_s22 = scalar_lea.vmem %s17_s13, 512 }
   0xb   :  { %p241_p3 = scmp.ne.s32.totalorder %s17_s13, %s240_s21  ;;  %p245_p4 = scmp.lt.s32.totalorder %s17_s13, %s17_s13 }
   0xc   :  { %p246_p5 = scmp.lt.s32.totalorder %s244_s22, %s240_s21 }
   0xe   :  { %p247_p6 = por %p246_p5, %p245_p4 }
  0x10   :  { %p248_p7 = pnand %p247_p6, %p241_p3 }
  0x12   :  { %251 = shalt.err (!%p248_p7)
}
  0x13   :  { %s325_s23 = smov 128   ;;  %s326_s24 = smov 8  }
  0x14   :  { %22 = dma.hbm_to_vmem [thread:$0]  %s410_s0, 256, %s17_s13, [#allocation3], %s325_s23, %s325_s23, %s326_s24  }
  0x15   :  { %27 = vsyncadd [#allocation6], 256  ;;  %s327_s27 = smov [#allocation5]   ;;  %s252_s4 = scalar_lea.hbm %s411_s1, 256 }
  0x16   :  { %s28_s28 = sshll.u32 %s327_s27, 4  ;;  %p253_p8 = scmp.ne.s32.totalorder %s411_s1, %s252_s4  ;;  %s29_s28 = int_to_ptr.vmem [resolvable:$true] %s28_s28 }
  0x17   :  { %p256_p9 = scmp.lt.u32.totalorder %s252_s4, %s411_s1 }
  0x19   :  { %p258_p10 = pnand %p256_p9, %p253_p8 }
  0x1b   :  { %261 = shalt.err (!%p258_p10)
}
  0x1c   :  { %s262_s9 = scalar_lea.vmem %s29_s28, 256  ;;  %s266_s0 = scalar_lea.vmem %s29_s28, 512 }
  0x1d   :  { %p263_p11 = scmp.ne.s32.totalorder %s29_s28, %s262_s9  ;;  %p267_p12 = scmp.lt.s32.totalorder %s29_s28, %s29_s28 }
  0x1e   :  { %p268_p13 = scmp.lt.s32.totalorder %s266_s0, %s262_s9 }
  0x20   :  { %p269_p0 = por %p268_p13, %p267_p12 }
  0x22   :  { %p270_p1 = pnand %p269_p0, %p263_p11 }
  0x24   :  { %273 = shalt.err (!%p270_p1)
}
  0x25   :  { %34 = dma.hbm_to_vmem [thread:$0]  %s411_s1, 256, %s29_s28, [#allocation6], %s325_s23, %s325_s23, %s326_s24  }
  0x26   :  { %39 = vsyncadd [#allocation6], 256  ;;  %s328_s12 = smov [#allocation7]   ;;  %s274_s16 = scalar_lea.hbm %s412_s2, 256 }
  0x27   :  { %s40_s13 = sshll.u32 %s328_s12, 4  ;;  %p275_p2 = scmp.ne.s32.totalorder %s412_s2, %s274_s16  ;;  %s41_s13 = int_to_ptr.vmem [resolvable:$true] %s40_s13 }
  0x28   :  { %p278_p3 = scmp.lt.u32.totalorder %s274_s16, %s412_s2 }
  0x2a   :  { %p280_p4 = pnand %p278_p3, %p275_p2 }
  0x2c   :  { %283 = shalt.err (!%p280_p4)
}
  0x2d   :  { %s284_s21 = scalar_lea.vmem %s41_s13, 256  ;;  %s288_s1 = scalar_lea.vmem %s41_s13, 512 }
  0x2e   :  { %p285_p5 = scmp.ne.s32.totalorder %s41_s13, %s284_s21  ;;  %p289_p6 = scmp.lt.s32.totalorder %s41_s13, %s41_s13 }
  0x2f   :  { %p290_p7 = scmp.lt.s32.totalorder %s288_s1, %s284_s21 }
  0x31   :  { %p291_p8 = por %p290_p7, %p289_p6 }
  0x33   :  { %p292_p9 = pnand %p291_p8, %p285_p5 }
  0x35   :  { %295 = shalt.err (!%p292_p9)
}
  0x36   :  { %46 = dma.hbm_to_vmem [thread:$0]  %s412_s2, 256, %s41_s13, [#allocation6], %s325_s23, %s325_s23, %s326_s24  }
  0x37   :  { %318 = dma.done.wait [#allocation3], 512  }
  0x38   :  { %319 = vsyncadd [#allocation3], 4294966784 }
  0x39   :  { %320 = dma.done.wait [#allocation6], 1024  }
  0x3a   :  { %321 = vsyncadd [#allocation6], 4294966272  ;;  %v134_v0 = vlaneseq  ;;  %v69_v3 = vld [vmem:[#allocation5] sm:$0xff]  ;;  %v70_v4 = vld [vmem:[#allocation5 + $0x8] sm:$0xff]  ;;  %s329_s2 = smov [#allocation8]  }
  0x3b   :  { %v73_v5 = vld [vmem:[#allocation7] sm:$0xff]  ;;  %v74_v6 = vld [vmem:[#allocation7 + $0x8] sm:$0xff]  ;;  %s210_s26 = sshll.u32 %s329_s2, 4  ;;  %s211_s26 = int_to_ptr.vmem [resolvable:$true] %s210_s26 }
  0x3c   :  { %v135_v1 = vshrl.u32 %v134_v0, 7  ;;  %v155_v7 = vmul.f32 %v73_v5, %v69_v3  ;;  %v65_v8 = vld [vmem:[#allocation2] sm:$0xff]  ;;  %v66_v9 = vld [vmem:[#allocation2 + $0x8] sm:$0xff]  ;;  %s296_s27 = scalar_lea.vmem %s211_s26, 640  ;;  %p301_p11 = scmp.lt.s32.totalorder %s211_s26, %s211_s26 }
  0x3d   :  { %v159_v13 = vmul.f32 %v73_v5, %v65_v8  ;;  %p297_p10 = scmp.ne.s32.totalorder %s211_s26, %s296_s27  ;;  %p302_p12 = scmp.lt.s32.totalorder %s296_s27, %s296_s27 }
  0x3e   :  { %v136_v2 = vadd.s32 8, %v135_v1 }
  0x3f   :  { %v163_v17 = vmul.f32 %v159_v13, %v69_v3  ;;  %p303_p13 = por %p302_p12, %p301_p11 }
  0x40   :  { %vm140_vm0 = vcmp.lt.s32.totalorder %v136_v2, 15 }
  0x41   :  { %v148_v10 = vsel %vm140_vm0, %v70_v4, 0.0  ;;  %v152_v11 = vsel %vm140_vm0, %v74_v6, 0.0  ;;  %v144_v12 = vsel %vm140_vm0, %v66_v9, 0.0  ;;  %v167_v21 = vmul.f32 %v163_v17, %v69_v3  ;;  %p304_p0 = pnand %p303_p13, %p297_p10 }
  0x42   :  { %v156_v14 = vmul.f32 %v152_v11, %v148_v10  ;;  %v179_v15 = vadd.f32 %v152_v11, %v73_v5  ;;  %v160_v16 = vmul.f32 %v152_v11, %v144_v12 }
  0x44   :  { %v172_v18 = vadd.f32 %v156_v14, %v155_v7  ;;  %v186_v19 = vadd.f32 %v160_v16, %v159_v13  ;;  %v164_v20 = vmul.f32 %v160_v16, %v148_v10  ;;  %183 = vst [vmem:[#allocation8 + $0x8] sm:$0xff] %v179_v15 }
  0x46   :  { %v193_v22 = vadd.f32 %v164_v20, %v163_v17  ;;  %v168_v23 = vmul.f32 %v164_v20, %v148_v10  ;;  %176 = vst [vmem:[#allocation8] sm:$0xff] %v172_v18  ;;  %190 = vst [vmem:[#allocation8 + $0x10] sm:$0xff] %v186_v19 }
  0x48   :  { %v200_v24 = vadd.f32 %v168_v23, %v167_v21  ;;  %197 = vst [vmem:[#allocation8 + $0x18] sm:$0xff] %v193_v22 }
  0x4a   :  { %204 = vst [vmem:[#allocation8 + $0x20] sm:$0xff] %v200_v24 }
  0x4b   :  { %307 = shalt.err (!%p304_p0)
}
  0x4c   :  { %s308_s30 = scalar_lea.hbm %s413_s3, 640 }
  0x4d   :  { %p309_p1 = scmp.ne.s32.totalorder %s413_s3, %s308_s30  ;;  %p312_p2 = scmp.lt.u32.totalorder %s308_s30, %s413_s3 }
  0x4f   :  { %p314_p3 = pnand %p312_p2, %p309_p1 }
  0x51   :  { %317 = shalt.err (!%p314_p3)
}
  0x52   :  { %216 = dma.vmem_to_hbm [thread:$0]  %s211_s26, 640, %s413_s3, [#allocation4], %s325_s23, %s325_s23, %s326_s24  }
  0x53   :  { %322 = dma.done.wait [#allocation4], 640  }
  0x54   :  { %323 = vsyncadd [#allocation4], 4294966656 }
  0x55   :  { %220 = vsyncpa [#allocation3], 1 }
  0x56   :  { %221 = vsyncpa [#allocation6], 1 }
  0x57   :  { %222 = vsyncpa [#allocation4], 1 }

</bundles_post_ra>
